<compile_context>
chip_gen: v7x
topology: tpu7x:2x2x1
jax: 0.10.0
libtpu: 0.0.40
codegen_flags: <defaults>
</compile_context>

<pallas_src>
import math

import jax
import jax.numpy as jnp
from jax import lax
from jax.experimental import pallas as pl
from jax.experimental.pallas import tpu as pltpu

# ----------------------- model hyper-parameters -----------------------------
EMBED_DIM = 32
NUM_HEADS = 4
HEAD_DIM = EMBED_DIM // NUM_HEADS
FFN_HIDDEN = 64
SEQ_LEN = 8
BATCH = 2
EPS = 1e-5
N_TOK = SEQ_LEN * BATCH              # flattened (seq, batch) token rows
HN = NUM_HEADS * N_TOK               # packed score columns (head-major blocks)

# ------------- coalesced weight-slab layout (128-aligned columns) -----------
OFF_WQKV = 0      # (E, 3E)  fused q|k|v projection (x @ W)
OFF_WO = 128      # (E, E)   attention output projection
OFF_W1 = 256      # (E, F)   FFN dense1
OFF_W2 = 384      # (F, E)   FFN dense2
OFF_HM = 512      # (HN, E)  head block-diagonal 0/1 mask
OFF_BM = 640      # (N, HN)  same-batch 0/1 mask (seq-major flattening)
OFF_VEC = 768     # (8, 3E)  biases + LayerNorm params, one row each
SLAB_ROWS = 64    # max(E, F, HN)
SLAB_COLS = 896


def _layernorm(z, gamma, beta):
    mu = jnp.mean(z, axis=-1, keepdims=True)
    var = jnp.mean((z - mu) ** 2, axis=-1, keepdims=True)
    return (z - mu) * lax.rsqrt(var + EPS) * gamma + beta


def transformer_block_kernel(x_ref, w_ref, o_ref):
    E, H, Dh, F, N = EMBED_DIM, NUM_HEADS, HEAD_DIM, FFN_HIDDEN, N_TOK

    x = x_ref[...].astype(jnp.float32)                        # (N, E)

    # ---- static, lane-tile-aligned slices of the coalesced slab ----
    wqkv = w_ref[0:E, OFF_WQKV:OFF_WQKV + 3 * E]              # (E, 3E)
    wo = w_ref[0:E, OFF_WO:OFF_WO + E]                        # (E, E)
    w1 = w_ref[0:E, OFF_W1:OFF_W1 + F]                        # (E, F)
    w2 = w_ref[0:F, OFF_W2:OFF_W2 + E]                        # (F, E)
    head_mask = w_ref[0:H * N, OFF_HM:OFF_HM + E]             # (HN, E)
    batch_mask = w_ref[0:N, OFF_BM:OFF_BM + H * N]            # (N, HN)
    b_qkv = w_ref[0:1, OFF_VEC:OFF_VEC + 3 * E]
    bf1 = w_ref[1:2, OFF_VEC:OFF_VEC + F]
    bo = w_ref[2:3, OFF_VEC:OFF_VEC + E]
    g1 = w_ref[3:4, OFF_VEC:OFF_VEC + E]
    be1 = w_ref[4:5, OFF_VEC:OFF_VEC + E]
    bf2 = w_ref[5:6, OFF_VEC:OFF_VEC + E]
    g2 = w_ref[6:7, OFF_VEC:OFF_VEC + E]
    be2 = w_ref[7:8, OFF_VEC:OFF_VEC + E]

    # ---- fused QKV projection: MXU push #1 ----
    qkv = jnp.dot(x, wqkv, preferred_element_type=jnp.float32) + b_qkv
    q = qkv[:, :E] * (1.0 / math.sqrt(Dh))                    # pre-scaled query
    k = qkv[:, E:2 * E]
    v = qkv[:, 2 * E:]

    # ---- all-head / all-batch scores: MXU push #2 (no k transpose) ----
    # k_bd is block-diagonal: head block h of columns only sees head h features.
    k_bd = jnp.tile(k, (H, 1)) * head_mask                    # (HN, E)
    s = lax.dot_general(q, k_bd, (((1,), (1,)), ((), ())),
                        preferred_element_type=jnp.float32)   # (N, HN)

    # Softmax numerator. Row-global shift cancels in ctx/denom; cross-batch
    # columns are zeroed with the precomputed 0/1 mask (no -inf select).
    # NOTE: shift is the row max over all heads; exact at these scales, could
    # underflow a head whose scores sit far below the row-global max.
    p = jnp.exp(s - jnp.max(s, axis=-1, keepdims=True)) * batch_mask

    # ---- fused context + per-head denominator: MXU push #3 ----
    v_bd = jnp.tile(v, (H, 1)) * head_mask                    # (HN, E)
    packed = jnp.concatenate([v_bd, head_mask], axis=-1)      # (HN, 2E)
    cd = jnp.dot(p, packed, preferred_element_type=jnp.float32)  # (N, 2E)
    ctx = cd[:, :E] / cd[:, E:]        # exact divide for PyTorch softmax parity

    # ---- output projection: MXU push #4 ----
    attn_out = jnp.dot(ctx, wo, preferred_element_type=jnp.float32) + bo

    # ---- AddNorm 1 (dropout = identity in eval mode) ----
    y = _layernorm(attn_out + x, g1, be1)

    # ---- position-wise FFN: MXU pushes #5, #6 ----
    h1 = jnp.maximum(
        jnp.dot(y, w1, preferred_element_type=jnp.float32) + bf1, 0.0)
    f = jnp.dot(h1, w2, preferred_element_type=jnp.float32) + bf2

    # ---- AddNorm 2 ----
    o_ref[...] = _layernorm(f + y, g2, be2).astype(o_ref.dtype)


def transformer_block(x_sbe, slab):
    """x_sbe: (S, B, E) float32, PyTorch MultiheadAttention layout."""
    S, B, E = x_sbe.shape
    N = S * B
    x_flat = x_sbe.reshape(N, E)      # pure reshape, no transpose / copy

    full = lambda shape: pl.BlockSpec(shape, lambda i: (0, 0))
    out_flat = pl.pallas_call(
        transformer_block_kernel,
        out_shape=jax.ShapeDtypeStruct((N, E), x_flat.dtype),
        grid_spec=pltpu.PrefetchScalarGridSpec(
            num_scalar_prefetch=0,
            grid=(1,),                # whole (tiny) problem in one step
            in_specs=[
                full((N, E)),                     # tokens
                full((SLAB_ROWS, SLAB_COLS)),     # one slab: all weights/masks
            ],
            out_specs=full((N, E)),
        ),
        compiler_params=pltpu.CompilerParams(
            dimension_semantics=("arbitrary",)),
    )(x_flat, slab)
    return out_flat.reshape(S, B, E)  # back to (S, B, E), again a free reshape


# -------------------- parameter construction / packing ----------------------
def init_raw_params(key):
    """Deterministic synthetic parameters in native PyTorch layouts."""
    keys = jax.random.split(key, 8)
    E, F = EMBED_DIM, FFN_HIDDEN
    scale = 0.1
    return dict(
        in_proj_w=jax.random.normal(keys[0], (3 * E, E), jnp.float32) * scale,
        in_proj_b=jax.random.normal(keys[1], (3 * E,), jnp.float32) * scale,
        out_proj_w=jax.random.normal(keys[2], (E, E), jnp.float32) * scale,
        out_proj_b=jax.random.normal(keys[3], (E,), jnp.float32) * scale,
        w1=jax.random.normal(keys[4], (F, E), jnp.float32) * scale,
        b1=jax.random.normal(keys[5], (F,), jnp.float32) * scale,
        w2=jax.random.normal(keys[6], (E, F), jnp.float32) * scale,
        b2=jax.random.normal(keys[7], (E,), jnp.float32) * scale,
        g1=jnp.ones((E,), jnp.float32), be1=jnp.zeros((E,), jnp.float32),
        g2=jnp.ones((E,), jnp.float32), be2=jnp.zeros((E,), jnp.float32),
    )


def pack_slab(p):
    """Pack every weight / bias / LN param / static mask into one f32 slab."""
    E, F, Dh, N = EMBED_DIM, FFN_HIDDEN, HEAD_DIM, N_TOK
    W = jnp.zeros((SLAB_ROWS, SLAB_COLS), jnp.float32)
    W = W.at[0:E, OFF_WQKV:OFF_WQKV + 3 * E].set(p["in_proj_w"].T)
    W = W.at[0:E, OFF_WO:OFF_WO + E].set(p["out_proj_w"].T)
    W = W.at[0:E, OFF_W1:OFF_W1 + F].set(p["w1"].T)
    W = W.at[0:F, OFF_W2:OFF_W2 + E].set(p["w2"].T)

    # head block-diagonal mask: score column block h only touches head h feats
    r = jnp.arange(HN)[:, None]
    c = jnp.arange(E)[None, :]
    head_mask = ((r // N) == (c // Dh)).astype(jnp.float32)       # (HN, E)
    W = W.at[0:HN, OFF_HM:OFF_HM + E].set(head_mask)

    # same-batch mask for seq-major flattened tokens: batch(row) = row % B
    rn = jnp.arange(N)[:, None]
    cn = jnp.arange(HN)[None, :]
    batch_mask = ((rn % BATCH) == (cn % BATCH)).astype(jnp.float32)  # (N, HN)
    W = W.at[0:N, OFF_BM:OFF_BM + HN].set(batch_mask)

    W = W.at[0, OFF_VEC:OFF_VEC + 3 * E].set(p["in_proj_b"])
    W = W.at[1, OFF_VEC:OFF_VEC + F].set(p["b1"])
    W = W.at[2, OFF_VEC:OFF_VEC + E].set(p["out_proj_b"])
    W = W.at[3, OFF_VEC:OFF_VEC + E].set(p["g1"])
    W = W.at[4, OFF_VEC:OFF_VEC + E].set(p["be1"])
    W = W.at[5, OFF_VEC:OFF_VEC + E].set(p["b2"])
    W = W.at[6, OFF_VEC:OFF_VEC + E].set(p["g2"])
    W = W.at[7, OFF_VEC:OFF_VEC + E].set(p["be2"])
    return W


# ----------------------- pure-JAX reference (eval mode) ----------------------
def reference_forward(x, p):
    S, B, E = x.shape
    H, Dh = NUM_HEADS, HEAD_DIM

    def ln(z, g, b):
        mu = jnp.mean(z, -1, keepdims=True)
        var = jnp.mean((z - mu) ** 2, -1, keepdims=True)
        return (z - mu) / jnp.sqrt(var + EPS) * g + b

    qkv = x @ p["in_proj_w"].T + p["in_proj_b"]
    q, k, v = jnp.split(qkv, 3, axis=-1)
    q = q.reshape(S, B, H, Dh) / math.sqrt(Dh)
    k = k.reshape(S, B, H, Dh)
    v = v.reshape(S, B, H, Dh)
    s = jnp.einsum("sbhd,tbhd->bhst", q, k)
    a = jax.nn.softmax(s, axis=-1)
    ctx = jnp.einsum("bhst,tbhd->sbhd", a, v).reshape(S, B, E)
    attn = ctx @ p["out_proj_w"].T + p["out_proj_b"]
    y = ln(attn + x, p["g1"], p["be1"])
    h1 = jax.nn.relu(y @ p["w1"].T + p["b1"])
    f = h1 @ p["w2"].T + p["b2"]
    return ln(f + y, p["g2"], p["be2"])


if __name__ == "__main__":
    key = jax.random.PRNGKey(0)
    pkey, xkey = jax.random.split(key)
    raw = init_raw_params(pkey)
    slab = pack_slab(raw)
    # PyTorch MultiheadAttention layout: (seq, batch, embed)
    x = jax.random.normal(xkey, (SEQ_LEN, BATCH, EMBED_DIM), jnp.float32)

    out = transformer_block(x, slab)
    out = jax.block_until_ready(out)
    assert out.shape == (SEQ_LEN, BATCH, EMBED_DIM)
    assert bool(jnp.all(jnp.isfinite(out)))

    ref = reference_forward(x, raw)
    err = float(jnp.max(jnp.abs(out - ref)))
    assert err < 1e-3, f"max abs error vs reference: {err}"
    print("KERNEL_OK")
</pallas_src>

<mosaic_0001>
module attributes {stable_mosaic.version = 11 : i64} {
  func.func @transformer_block_kernel(%arg0: i32, %arg1: memref<16x32xf32, #tpu.memory_space<vmem>>, %arg2: memref<64x896xf32, #tpu.memory_space<vmem>>, %arg3: memref<16x32xf32, #tpu.memory_space<vmem>>) attributes {dimension_semantics = [#tpu.dimension_semantics<arbitrary>], iteration_bounds = array<i64: 1>, scalar_prefetch = 0 : i64, scratch_operands = 0 : i64, tpu.core_type = #tpu.core_type<tc>, window_params = [{pipeline_mode = #tpu.pipeline_mode<synchronous>, transform_indices = @transform_0, window_bounds = array<i64: 16, 32>}, {pipeline_mode = #tpu.pipeline_mode<synchronous>, transform_indices = @transform_1, window_bounds = array<i64: 64, 896>}, {pipeline_mode = #tpu.pipeline_mode<synchronous>, transform_indices = @transform_2, window_bounds = array<i64: 16, 32>}]} {
    %c0 = arith.constant 0 : index
    %c0_0 = arith.constant 0 : index
    %0 = vector.load %arg1[%c0, %c0_0] : memref<16x32xf32, #tpu.memory_space<vmem>>, vector<16x32xf32>
    %c0_1 = arith.constant 0 : index
    %c0_2 = arith.constant 0 : index
    %1 = vector.load %arg2[%c0_1, %c0_2] : memref<64x896xf32, #tpu.memory_space<vmem>>, vector<32x96xf32>
    %c0_3 = arith.constant 0 : index
    %c128 = arith.constant 128 : index
    %2 = vector.load %arg2[%c0_3, %c128] : memref<64x896xf32, #tpu.memory_space<vmem>>, vector<32x32xf32>
    %c0_4 = arith.constant 0 : index
    %c256 = arith.constant 256 : index
    %3 = vector.load %arg2[%c0_4, %c256] : memref<64x896xf32, #tpu.memory_space<vmem>>, vector<32x64xf32>
    %c0_5 = arith.constant 0 : index
    %c384 = arith.constant 384 : index
    %4 = vector.load %arg2[%c0_5, %c384] : memref<64x896xf32, #tpu.memory_space<vmem>>, vector<64x32xf32>
    %c0_6 = arith.constant 0 : index
    %c512 = arith.constant 512 : index
    %5 = vector.load %arg2[%c0_6, %c512] : memref<64x896xf32, #tpu.memory_space<vmem>>, vector<64x32xf32>
    %c0_7 = arith.constant 0 : index
    %c640 = arith.constant 640 : index
    %6 = vector.load %arg2[%c0_7, %c640] : memref<64x896xf32, #tpu.memory_space<vmem>>, vector<16x64xf32>
    %c0_8 = arith.constant 0 : index
    %c768 = arith.constant 768 : index
    %7 = vector.load %arg2[%c0_8, %c768] : memref<64x896xf32, #tpu.memory_space<vmem>>, vector<1x96xf32>
    %c1 = arith.constant 1 : index
    %c768_9 = arith.constant 768 : index
    %8 = vector.load %arg2[%c1, %c768_9] : memref<64x896xf32, #tpu.memory_space<vmem>>, vector<1x64xf32>
    %c2 = arith.constant 2 : index
    %c768_10 = arith.constant 768 : index
    %9 = vector.load %arg2[%c2, %c768_10] : memref<64x896xf32, #tpu.memory_space<vmem>>, vector<1x32xf32>
    %c3 = arith.constant 3 : index
    %c768_11 = arith.constant 768 : index
    %10 = vector.load %arg2[%c3, %c768_11] : memref<64x896xf32, #tpu.memory_space<vmem>>, vector<1x32xf32>
    %c4 = arith.constant 4 : index
    %c768_12 = arith.constant 768 : index
    %11 = vector.load %arg2[%c4, %c768_12] : memref<64x896xf32, #tpu.memory_space<vmem>>, vector<1x32xf32>
    %c5 = arith.constant 5 : index
    %c768_13 = arith.constant 768 : index
    %12 = vector.load %arg2[%c5, %c768_13] : memref<64x896xf32, #tpu.memory_space<vmem>>, vector<1x32xf32>
    %c6 = arith.constant 6 : index
    %c768_14 = arith.constant 768 : index
    %13 = vector.load %arg2[%c6, %c768_14] : memref<64x896xf32, #tpu.memory_space<vmem>>, vector<1x32xf32>
    %c7 = arith.constant 7 : index
    %c768_15 = arith.constant 768 : index
    %14 = vector.load %arg2[%c7, %c768_15] : memref<64x896xf32, #tpu.memory_space<vmem>>, vector<1x32xf32>
    %cst = arith.constant dense<0.000000e+00> : vector<16x96xf32>
    %15 = tpu.matmul %0, %1, %cst {dimension_numbers = #tpu.dot_dimension_numbers<[1], [0], [0], [1], [0, 0, 1, 1], [], []>} : vector<16x32xf32>, vector<32x96xf32>, vector<16x96xf32> -> vector<16x96xf32>
    %16 = vector.broadcast %7 : vector<1x96xf32> to vector<16x96xf32>
    %17 = arith.addf %15, %16 : vector<16x96xf32>
    %18 = vector.extract_strided_slice %17 {offsets = [0, 0], sizes = [16, 32], strides = [1, 1]} : vector<16x96xf32> to vector<16x32xf32>
    %cst_16 = arith.constant 0.353553385 : f32
    %19 = vector.broadcast %cst_16 : f32 to vector<16x32xf32>
    %20 = arith.mulf %18, %19 : vector<16x32xf32>
    %21 = vector.extract_strided_slice %17 {offsets = [0, 32], sizes = [16, 32], strides = [1, 1]} : vector<16x96xf32> to vector<16x32xf32>
    %22 = vector.extract_strided_slice %17 {offsets = [0, 64], sizes = [16, 32], strides = [1, 1]} : vector<16x96xf32> to vector<16x32xf32>
    %23 = tpu.concatenate %21, %21, %21, %21 in 0 : vector<16x32xf32>, vector<16x32xf32>, vector<16x32xf32>, vector<16x32xf32> -> vector<64x32xf32>
    %24 = arith.mulf %23, %5 : vector<64x32xf32>
    %cst_17 = arith.constant dense<0.000000e+00> : vector<16x64xf32>
    %25 = tpu.matmul %20, %24, %cst_17 {dimension_numbers = #tpu.dot_dimension_numbers<[1], [1], [0], [0], [0, 0, 1, 0], [], []>} : vector<16x32xf32>, vector<64x32xf32>, vector<16x64xf32> -> vector<16x64xf32>
    %cst_18 = arith.constant dense<0xFF800000> : vector<16xf32>
    %26 = vector.multi_reduction <maximumf>, %25, %cst_18 [1] : vector<16x64xf32> to vector<16xf32>
    %27 = vector.shape_cast %26 : vector<16xf32> to vector<16x1xf32>
    %28 = vector.broadcast %27 : vector<16x1xf32> to vector<16x64xf32>
    %29 = arith.subf %25, %28 : vector<16x64xf32>
    %30 = math.exp %29 : vector<16x64xf32>
    %31 = arith.mulf %30, %6 : vector<16x64xf32>
    %32 = tpu.concatenate %22, %22, %22, %22 in 0 : vector<16x32xf32>, vector<16x32xf32>, vector<16x32xf32>, vector<16x32xf32> -> vector<64x32xf32>
    %33 = arith.mulf %32, %5 : vector<64x32xf32>
    %34 = tpu.concatenate %33, %5 in 1 : vector<64x32xf32>, vector<64x32xf32> -> vector<64x64xf32>
    %cst_19 = arith.constant dense<0.000000e+00> : vector<16x64xf32>
    %35 = tpu.matmul %31, %34, %cst_19 {dimension_numbers = #tpu.dot_dimension_numbers<[1], [0], [0], [1], [0, 0, 1, 1], [], []>} : vector<16x64xf32>, vector<64x64xf32>, vector<16x64xf32> -> vector<16x64xf32>
    %36 = vector.extract_strided_slice %35 {offsets = [0, 0], sizes = [16, 32], strides = [1, 1]} : vector<16x64xf32> to vector<16x32xf32>
    %37 = vector.extract_strided_slice %35 {offsets = [0, 32], sizes = [16, 32], strides = [1, 1]} : vector<16x64xf32> to vector<16x32xf32>
    %38 = arith.divf %36, %37 : vector<16x32xf32>
    %cst_20 = arith.constant dense<0.000000e+00> : vector<16x32xf32>
    %39 = tpu.matmul %38, %2, %cst_20 {dimension_numbers = #tpu.dot_dimension_numbers<[1], [0], [0], [1], [0, 0, 1, 1], [], []>} : vector<16x32xf32>, vector<32x32xf32>, vector<16x32xf32> -> vector<16x32xf32>
    %40 = vector.broadcast %9 : vector<1x32xf32> to vector<16x32xf32>
    %41 = arith.addf %39, %40 : vector<16x32xf32>
    %42 = arith.addf %41, %0 : vector<16x32xf32>
    %cst_21 = arith.constant dense<0.000000e+00> : vector<16xf32>
    %43 = vector.multi_reduction <add>, %42, %cst_21 [1] : vector<16x32xf32> to vector<16xf32>
    %44 = vector.shape_cast %43 : vector<16xf32> to vector<16x1xf32>
    %cst_22 = arith.constant 3.200000e+01 : f32
    %45 = vector.broadcast %cst_22 : f32 to vector<16x1xf32>
    %46 = arith.divf %44, %45 : vector<16x1xf32>
    %47 = vector.broadcast %46 : vector<16x1xf32> to vector<16x32xf32>
    %48 = arith.subf %42, %47 : vector<16x32xf32>
    %49 = arith.mulf %48, %48 : vector<16x32xf32>
    %cst_23 = arith.constant dense<0.000000e+00> : vector<16xf32>
    %50 = vector.multi_reduction <add>, %49, %cst_23 [1] : vector<16x32xf32> to vector<16xf32>
    %51 = vector.shape_cast %50 : vector<16xf32> to vector<16x1xf32>
    %cst_24 = arith.constant 3.200000e+01 : f32
    %52 = vector.broadcast %cst_24 : f32 to vector<16x1xf32>
    %53 = arith.divf %51, %52 : vector<16x1xf32>
    %54 = vector.broadcast %46 : vector<16x1xf32> to vector<16x32xf32>
    %55 = arith.subf %42, %54 : vector<16x32xf32>
    %cst_25 = arith.constant 9.99999974E-6 : f32
    %56 = vector.broadcast %cst_25 : f32 to vector<16x1xf32>
    %57 = arith.addf %53, %56 : vector<16x1xf32>
    %58 = math.rsqrt %57 : vector<16x1xf32>
    %59 = vector.broadcast %58 : vector<16x1xf32> to vector<16x32xf32>
    %60 = arith.mulf %55, %59 : vector<16x32xf32>
    %61 = vector.broadcast %10 : vector<1x32xf32> to vector<16x32xf32>
    %62 = arith.mulf %60, %61 : vector<16x32xf32>
    %63 = vector.broadcast %11 : vector<1x32xf32> to vector<16x32xf32>
    %64 = arith.addf %62, %63 : vector<16x32xf32>
    %cst_26 = arith.constant dense<0.000000e+00> : vector<16x64xf32>
    %65 = tpu.matmul %64, %3, %cst_26 {dimension_numbers = #tpu.dot_dimension_numbers<[1], [0], [0], [1], [0, 0, 1, 1], [], []>} : vector<16x32xf32>, vector<32x64xf32>, vector<16x64xf32> -> vector<16x64xf32>
    %66 = vector.broadcast %8 : vector<1x64xf32> to vector<16x64xf32>
    %67 = arith.addf %65, %66 : vector<16x64xf32>
    %cst_27 = arith.constant 0.000000e+00 : f32
    %68 = vector.broadcast %cst_27 : f32 to vector<16x64xf32>
    %69 = arith.maximumf %67, %68 : vector<16x64xf32>
    %cst_28 = arith.constant dense<0.000000e+00> : vector<16x32xf32>
    %70 = tpu.matmul %69, %4, %cst_28 {dimension_numbers = #tpu.dot_dimension_numbers<[1], [0], [0], [1], [0, 0, 1, 1], [], []>} : vector<16x64xf32>, vector<64x32xf32>, vector<16x32xf32> -> vector<16x32xf32>
    %71 = vector.broadcast %12 : vector<1x32xf32> to vector<16x32xf32>
    %72 = arith.addf %70, %71 : vector<16x32xf32>
    %73 = arith.addf %72, %64 : vector<16x32xf32>
    %cst_29 = arith.constant dense<0.000000e+00> : vector<16xf32>
    %74 = vector.multi_reduction <add>, %73, %cst_29 [1] : vector<16x32xf32> to vector<16xf32>
    %75 = vector.shape_cast %74 : vector<16xf32> to vector<16x1xf32>
    %cst_30 = arith.constant 3.200000e+01 : f32
    %76 = vector.broadcast %cst_30 : f32 to vector<16x1xf32>
    %77 = arith.divf %75, %76 : vector<16x1xf32>
    %78 = vector.broadcast %77 : vector<16x1xf32> to vector<16x32xf32>
    %79 = arith.subf %73, %78 : vector<16x32xf32>
    %80 = arith.mulf %79, %79 : vector<16x32xf32>
    %cst_31 = arith.constant dense<0.000000e+00> : vector<16xf32>
    %81 = vector.multi_reduction <add>, %80, %cst_31 [1] : vector<16x32xf32> to vector<16xf32>
    %82 = vector.shape_cast %81 : vector<16xf32> to vector<16x1xf32>
    %cst_32 = arith.constant 3.200000e+01 : f32
    %83 = vector.broadcast %cst_32 : f32 to vector<16x1xf32>
    %84 = arith.divf %82, %83 : vector<16x1xf32>
    %85 = vector.broadcast %77 : vector<16x1xf32> to vector<16x32xf32>
    %86 = arith.subf %73, %85 : vector<16x32xf32>
    %cst_33 = arith.constant 9.99999974E-6 : f32
    %87 = vector.broadcast %cst_33 : f32 to vector<16x1xf32>
    %88 = arith.addf %84, %87 : vector<16x1xf32>
    %89 = math.rsqrt %88 : vector<16x1xf32>
    %90 = vector.broadcast %89 : vector<16x1xf32> to vector<16x32xf32>
    %91 = arith.mulf %86, %90 : vector<16x32xf32>
    %92 = vector.broadcast %13 : vector<1x32xf32> to vector<16x32xf32>
    %93 = arith.mulf %91, %92 : vector<16x32xf32>
    %94 = vector.broadcast %14 : vector<1x32xf32> to vector<16x32xf32>
    %95 = arith.addf %93, %94 : vector<16x32xf32>
    %c0_34 = arith.constant 0 : index
    %c0_35 = arith.constant 0 : index
    %96 = vector.load %arg3[%c0_34, %c0_35] : memref<16x32xf32, #tpu.memory_space<vmem>>, vector<16x32xf32>
    tpu.vector_store %arg3[%c0_34, %c0_35], %95 {strides = array<i32>} : memref<16x32xf32, #tpu.memory_space<vmem>>, vector<16x32xf32>,
    return
  }
  func.func @transform_0(%arg0: i32) -> (i32, i32) {
    %c0_i32 = arith.constant 0 : i32
    %c0_i32_0 = arith.constant 0 : i32
    %c0_i32_1 = arith.constant 0 : i32
    return %c0_i32, %c0_i32_0 : i32, i32
  }
  func.func @transform_1(%arg0: i32) -> (i32, i32) {
    %c0_i32 = arith.constant 0 : i32
    %c0_i32_0 = arith.constant 0 : i32
    %c0_i32_1 = arith.constant 0 : i32
    return %c0_i32, %c0_i32_0 : i32, i32
  }
  func.func @transform_2(%arg0: i32) -> (i32, i32) {
    %c0_i32 = arith.constant 0 : i32
    %c0_i32_0 = arith.constant 0 : i32
    %c0_i32_1 = arith.constant 0 : i32
    return %c0_i32, %c0_i32_0 : i32, i32
  }
}

</mosaic_0001>

<bundles_post_ra>
// kernel: tpu_custom_call.1
= control target key start
LH: loop header
LB: loop body
LE: loop exit
PB: predicated region body
PF: predicated region fallthrough
CT: control target
= control target key end

     0   :  { %7 = vsyncpa [#allocation3], 0  ;;  %s1412_s0 = inlined_call_operand.hbm [shape: f32[16,32], index: 0, kind: input, shape index: {}]   ;;  %s1413_s1 = inlined_call_operand.hbm [shape: f32[64,896], index: 1, kind: input, shape index: {}]   ;;  %s1414_s2 = inlined_call_operand.hbm [shape: f32[16,32], index: 2, kind: output, shape index: {}]  }
   0x1   :  { %8 = vsyncpa [#allocation6], 0 }
   0x2   :  { %9 = vsyncpa [#allocation4], 0  ;;  %s1211_s9 = smov [#allocation2]   ;;  %s1139_s13 = scalar_lea.hbm %s1412_s0, 256 }
   0x3   :  { %s15_s10 = sshll.u32 %s1211_s9, 4  ;;  %p1140_p0 = scmp.ne.s32.totalorder %s1412_s0, %s1139_s13  ;;  %s16_s10 = int_to_ptr.vmem [resolvable:$true] %s15_s10 }
   0x4   :  { %p1143_p1 = scmp.lt.u32.totalorder %s1139_s13, %s1412_s0 }
   0x6   :  { %p1145_p2 = pnand %p1143_p1, %p1140_p0 }
   0x8   :  { %1148 = shalt.err (!%p1145_p2)
}
   0x9   :  { %s1149_s18 = scalar_lea.vmem %s16_s10, 256  ;;  %p1154_p4 = scmp.lt.s32.totalorder %s16_s10, %s16_s10 }
   0xa   :  { %p1150_p3 = scmp.ne.s32.totalorder %s16_s10, %s1149_s18  ;;  %p1155_p5 = scmp.lt.s32.totalorder %s1149_s18, %s1149_s18 }
   0xc   :  { %p1156_p6 = por %p1155_p5, %p1154_p4 }
   0xe   :  { %p1157_p7 = pnand %p1156_p6, %p1150_p3 }
  0x10   :  { %1160 = shalt.err (!%p1157_p7)
}
  0x11   :  { %s1212_s19 = smov 128   ;;  %s1213_s20 = smov 8  }
  0x12   :  { %21 = dma.hbm_to_vmem [thread:$0]  %s1412_s0, 256, %s16_s10, [#allocation3], %s1212_s19, %s1212_s19, %s1213_s20  }
  0x13   :  { %s1214_s23 = smov [#allocation5]   ;;  %s1161_s27 = scalar_lea.hbm %s1413_s1, 7168 }
  0x14   :  { %s27_s24 = sshll.u32 %s1214_s23, 4  ;;  %p1162_p8 = scmp.ne.s32.totalorder %s1413_s1, %s1161_s27  ;;  %s28_s24 = int_to_ptr.vmem [resolvable:$true] %s27_s24 }
  0x15   :  { %p1165_p9 = scmp.lt.u32.totalorder %s1161_s27, %s1413_s1 }
  0x17   :  { %p1167_p10 = pnand %p1165_p9, %p1162_p8 }
  0x19   :  { %1170 = shalt.err (!%p1167_p10)
}
  0x1a   :  { %s1171_s4 = scalar_lea.vmem %s28_s24, 7168  ;;  %p1176_p12 = scmp.lt.s32.totalorder %s28_s24, %s28_s24 }
  0x1b   :  { %p1172_p11 = scmp.ne.s32.totalorder %s28_s24, %s1171_s4  ;;  %p1177_p13 = scmp.lt.s32.totalorder %s1171_s4, %s1171_s4 }
  0x1d   :  { %p1178_p0 = por %p1177_p13, %p1176_p12 }
  0x1f   :  { %p1179_p1 = pnand %p1178_p0, %p1172_p11 }
  0x21   :  { %1182 = shalt.err (!%p1179_p1)
}
  0x22   :  { %s1215_s0 = smov 896   ;;  %s1216_s5 = smov 56  }
  0x23   :  { %33 = dma.hbm_to_vmem [thread:$0]  %s1413_s1, 7168, %s28_s24, [#allocation6], %s1215_s0, %s1215_s0, %s1216_s5  }
  0x24   :  { %1205 = dma.done.wait [#allocation3], 256  }
  0x25   :  { %1206 = vsyncadd [#allocation3], 4294967040 }
  0x26   :  { %1207 = dma.done.wait [#allocation6], 7168  }
  0x27   :  { %1208 = vsyncadd [#allocation6], 4294960128  ;;  %vm80_vm0 = vcmask 261120   ;;  %v42_v0 = vld [vmem:[#allocation5] sm:$0xff]  ;;  %v43_v1 = vld [vmem:[#allocation5 + $0x38] sm:$0xff]  ;;  %s1217_s1 = smov 32  }
  0x28   :  { %v44_v2 = vld [vmem:[#allocation5 + $0x70] sm:$0xff]  ;;  %v993_v3 = vpack.c.bf16 %v43_v1, %v42_v0  ;;  %v45_v4 = vld [vmem:[#allocation5 + $0xa8] sm:$0xff]  ;;  %v62_v8 = vld [vmem:[#allocation5 + $0x20] sm:$0xff]  ;;  %s1218_s8 = smov 96   ;;  %s1219_s9 = smov 64   ;;  %vm325_vm2 = vcmask 523264  }
  0x29   :  { %v1263_v5 = vld [vmem:[#allocation2] sm:$0xff]  ;;  %v997_v6 = vpack.c.bf16 %v45_v4, %v44_v2  ;;  %172 = vrot.lane.b32.xlu0 %v62_v8, %s1217_s1  ;;  %v65_v9 = vld [vmem:[#allocation5 + $0xc8] sm:$0xff]  ;;  %v63_v10 = vld [vmem:[#allocation5 + $0x58] sm:$0xff]  ;;  %s1220_s10 = smov [#allocation7]  }
  0x2a   :  { %911 = vmatprep.mubr.msk.f32.mxu0 %vm80_vm0, %v1263_v5  ;;  %v64_v7 = vld [vmem:[#allocation5 + $0x90] sm:$0xff]  ;;  %994 = vmatprep.subr.bf16.mxu0 %v993_v3  ;;  %v1267_v11 = vld [vmem:[#allocation2 + $0x8] sm:$0xff]  ;;  %v66_v13 = vld [vmem:[#allocation5 + $0x100] sm:$0xff]  ;;  %s822_s11 = sshll.u32 %s1220_s10, 4  ;;  %s823_s11 = int_to_ptr.vmem [resolvable:$true] %s822_s11 }
  0x2b   :  { %176 = vrot.lane.b32.xlu1 %v64_v7, %s1217_s1  ;;  %996 = vmatpush3.bf16.msra.mxu0 %v993_v3  ;;  %v67_v12 = vld [vmem:[#allocation5 + $0x138] sm:$0xff]  ;;  %v69_v14 = vld [vmem:[#allocation5 + $0x1a8] sm:$0xff]  ;;  %v68_v15 = vld [vmem:[#allocation5 + $0x170] sm:$0xff]  ;;  %s1183_s12 = scalar_lea.vmem %s823_s11, 256  ;;  %p1188_p3 = scmp.lt.s32.totalorder %s823_s11, %s823_s11 }
  0x2c   :  { %998 = vmatprep.subr.bf16.mxu0 %v997_v6  ;;  %v72_v22 = vld [vmem:[#allocation5 + $0x30] ss:$0 sm:$0xff]  ;;  %vm1323_vm1 = vmpackc.low %vm80_vm0, %vm80_vm0  ;;  %p1184_p2 = scmp.ne.s32.totalorder %s823_s11, %s1183_s12  ;;  %p1189_p4 = scmp.lt.s32.totalorder %s1183_s12, %s1183_s12 }
  0x2d   :  { %174 = vrot.lane.b32.xlu0 %v63_v10, %s1217_s1 }
  0x2e   :  { %p1190_p5 = por %p1189_p4, %p1188_p3 }
  0x2f   :  { %178 = vrot.lane.b32.xlu1 %v65_v9, %s1217_s1  ;;  %1000 = vmatpush3.bf16.msra.mxu0 %v997_v6 }
  0x30   :  { %p1191_p6 = pnand %p1190_p5, %p1184_p2 }
  0x31   :  { %180 = vrot.lane.b32.xlu0 %v66_v13, %s1217_s1 }
  0x32   :  { %912 = vmatmul.mubr.msk.f32.vlgmr.msra.gmra.mrb[0].mxu0 %vm80_vm0, %v1267_v11 }
  0x33   :  { %182 = vrot.lane.b32.xlu1 %v67_v12, %s1217_s1 }
  0x35   :  { %184 = vrot.lane.b32.xlu0 %v68_v15, %s1217_s1 }
  0x37   :  { %186 = vrot.lane.b32.xlu1 %v69_v14, %s1217_s1 }
  0x9b   :  { %v1273_v17 = vpop.permute.xlu0 %172 }
  0x9d   :  { %v1271_v16 = vpop.permute.xlu1 %176 }
  0x9f   :  { %v1277_v19 = vpop.permute.xlu0 %174 }
  0xa1   :  { %v1275_v18 = vpop.permute.xlu1 %178 }
  0xa3   :  { %v1281_v21 = vpop.permute.xlu0 %180 }
  0xa5   :  { %v1279_v20 = vpop.permute.xlu1 %182 }
  0xa7   :  { %v1289_v28 = vpop.permute.xlu0 %184 }
  0xa9   :  { %v1287_v27 = vpop.permute.xlu1 %186 }
 0x105   :  { %v913_v23 = vpop.f32.mrb[0].mxu0 }
 0x106   :  { %v1283_v24 = vadd.f32 %v913_v23, %v72_v22  ;;  %v153_v25 = vpop.f32.mrb[1].mxu0 }
 0x107   :  { %v1285_v26 = vadd.f32 %v153_v25, %v72_v22 }
 0x108   :  { %v199_v29 = vmul.f32 %v1275_v18, %v1283_v24  ;;  %v197_v30 = vmul.f32 %v1277_v19, %v1283_v24  ;;  %v203_v34 = vmul.f32 %v1287_v27, %v1283_v24  ;;  %v201_v35 = vmul.f32 %v1279_v20, %v1283_v24 }
 0x109   :  { %v162_v31 = vmul.f32 0.35355338, %v1285_v26  ;;  %v198_v32 = vmul.f32 %v1271_v16, %v1285_v26  ;;  %v196_v33 = vmul.f32 %v1273_v17, %v1285_v26  ;;  %v202_v36 = vmul.f32 %v1289_v28, %v1285_v26 }
 0x10a   :  { %v200_v39 = vmul.f32 %v1281_v21, %v1285_v26 }
 0x10b   :  { %930 = vmatprep.mubr.msk.f32.mxu1 %vm80_vm0, %v162_v31  ;;  %v1088_v37 = vpack.i.bf16 %v199_v29, %v198_v32  ;;  %v1083_v38 = vpack.i.bf16 %v197_v30, %v196_v33  ;;  %v1098_v40 = vpack.i.bf16 %v203_v34, %v202_v36 }
 0x10c   :  { %v1093_v41 = vpack.i.bf16 %v201_v35, %v200_v39 }
 0x10d   :  { %1089 = vrot.lane.b32.xlu1 %v1088_v37, %s1218_s8  ;;  %1084 = vrot.lane.b32.xlu0 %v1083_v38, %s1218_s8 }
 0x111   :  { %1099 = vrot.lane.b32.xlu1 %v1098_v40, %s1218_s8  ;;  %1094 = vrot.lane.b32.xlu0 %v1093_v41, %s1218_s8 }
 0x115   :  { %342 = vrot.lane.b32.xlu1 %v63_v10, %s1219_s9  ;;  %340 = vrot.lane.b32.xlu0 %v62_v8, %s1219_s9 }
 0x119   :  { %346 = vrot.lane.b32.xlu1 %v65_v9, %s1219_s9  ;;  %344 = vrot.lane.b32.xlu0 %v64_v7, %s1219_s9 }
 0x11d   :  { %350 = vrot.lane.b32.xlu1 %v67_v12, %s1219_s9  ;;  %348 = vrot.lane.b32.xlu0 %v66_v13, %s1219_s9  ;;  %v163_v12 = vmul.f32 0.35355338, %v1283_v24 }
 0x121   :  { %354 = vrot.lane.b32.xlu1 %v69_v14, %s1219_s9  ;;  %352 = vrot.lane.b32.xlu0 %v68_v15, %s1219_s9 }
 0x17f   :  { %v1090_v42 = vpop.permute.xlu1 %1089  ;;  %v1085_v43 = vpop.permute.xlu0 %1084 }
 0x180   :  { %v1092_v44 = vunpack.i.h.bf16 %v1090_v42  ;;  %v1091_v45 = vunpack.i.l.bf16 %v1090_v42  ;;  %v1087_v46 = vunpack.i.h.bf16 %v1085_v43  ;;  %v1086_v47 = vunpack.i.l.bf16 %v1085_v43 }
 0x182   :  { %v1001_v49 = vpack.c.bf16 %v1087_v46, %v1086_v47  ;;  %v1007_v52 = vpack.c.bf16 %v1092_v44, %v1091_v45 }
 0x183   :  { %v1100_v50 = vpop.permute.xlu1 %1099  ;;  %v1095_v51 = vpop.permute.xlu0 %1094 }
 0x184   :  { %1003 = vmatprep.subr.msk.bf16.mxu1 %vm1323_vm1, %v1001_v49  ;;  %v1097_v55 = vunpack.i.h.bf16 %v1095_v51  ;;  %v1096_v56 = vunpack.i.l.bf16 %v1095_v51  ;;  %v1102_v4 = vunpack.i.h.bf16 %v1100_v50  ;;  %v1101_v6 = vunpack.i.l.bf16 %v1100_v50 }
 0x185   :  { %1006 = vmatpush3.bf16.xpose.msk.msra.mxu1 %vm1323_vm1, %v1001_v49 }
 0x186   :  { %1009 = vmatprep.subr.msk.bf16.mxu1 %vm1323_vm1, %v1007_v52  ;;  %v1013_v62 = vpack.c.bf16 %v1097_v55, %v1096_v56  ;;  %v1019_v10 = vpack.c.bf16 %v1102_v4, %v1101_v6  ;;  %v70_v56 = vld [vmem:[#allocation5 + $0x28] sm:$0xff] }
 0x187   :  { %v343_v53 = vpop.permute.xlu1 %342  ;;  %v341_v54 = vpop.permute.xlu0 %340 }
 0x188   :  { %v365_v57 = vmul.f32 %v343_v53, %v1283_v24  ;;  %v364_v58 = vmul.f32 %v341_v54, %v1285_v26 }
 0x18a   :  { %v1103_v59 = vpack.i.bf16 %v365_v57, %v364_v58  ;;  %v71_v58 = vld [vmem:[#allocation5 + $0x60] sm:$0xff] }
 0x18b   :  { %v347_v60 = vpop.permute.xlu1 %346  ;;  %v345_v61 = vpop.permute.xlu0 %344 }
 0x18c   :  { %v367_v63 = vmul.f32 %v347_v60, %v1283_v24  ;;  %v366_v0 = vmul.f32 %v345_v61, %v1285_v26  ;;  %1104 = vrot.lane.b32.xlu0 %v1103_v59, %s1219_s9 }
 0x18d   :  { %1012 = vmatpush3.bf16.xpose.msk.msra.mxu1 %vm1323_vm1, %v1007_v52 }
 0x18e   :  { %v1108_v1 = vpack.i.bf16 %v367_v63, %v366_v0  ;;  %1015 = vmatprep.subr.msk.bf16.mxu1 %vm1323_vm1, %v1013_v62 }
 0x18f   :  { %v351_v2 = vpop.permute.xlu1 %350  ;;  %v349_v3 = vpop.permute.xlu0 %348 }
 0x190   :  { %v369_v7 = vmul.f32 %v351_v2, %v1283_v24  ;;  %v368_v8 = vmul.f32 %v349_v3, %v1285_v26  ;;  %1109 = vrot.lane.b32.xlu1 %v1108_v1, %s1219_s9 }
 0x192   :  { %v1113_v9 = vpack.i.bf16 %v369_v7, %v368_v8 }
 0x193   :  { %v353_v13 = vpop.permute.xlu0 %352  ;;  %v355_v14 = vpop.permute.xlu1 %354 }
 0x194   :  { %v371_v39 = vmul.f32 %v355_v14, %v1283_v24  ;;  %v370_v40 = vmul.f32 %v353_v13, %v1285_v26 }
 0x195   :  { %1018 = vmatpush3.bf16.xpose.msk.msra.mxu1 %vm1323_vm1, %v1013_v62  ;;  %v49_v62 = vld [vmem:[#allocation5 + $0xb0] sm:$0xff] }
 0x196   :  { %1021 = vmatprep.subr.msk.bf16.mxu1 %vm1323_vm1, %v1019_v10 }
 0x19d   :  { %1024 = vmatpush3.bf16.xpose.msk.msra.mxu1 %vm1323_vm1, %v1019_v10 }
 0x1a4   :  { %931 = vmatmul.mubr.msk.f32.vlgmr.msra.gmra.mrb[0].mxu1 %vm80_vm0, %v163_v12 }
 0x1fe   :  { %v1105_v15 = vpop.permute.xlu0 %1104 }
 0x1ff   :  { %v1107_v22 = vunpack.i.h.bf16 %v1105_v15  ;;  %v1106_v23 = vunpack.i.l.bf16 %v1105_v15 }
 0x201   :  { %v404_v25 = vsel %vm80_vm0, %v1106_v23, %v1273_v17  ;;  %v405_v29 = vsel %vm80_vm0, %v1107_v22, %v1277_v19 }
 0x202   :  { %v1110_v30 = vpop.permute.xlu1 %1109  ;;  %v1025_v31 = vpack.c.bf16 %v405_v29, %v404_v25 }
 0x203   :  { %v1112_v32 = vunpack.i.h.bf16 %v1110_v30  ;;  %v1111_v33 = vunpack.i.l.bf16 %v1110_v30 }
 0x204   :  { %1026 = vmatprep.subr.bf16.mxu0 %v1025_v31 }
 0x205   :  { %1028 = vmatpush3.bf16.msra.mxu0 %v1025_v31  ;;  %v406_v34 = vsel %vm80_vm0, %v1111_v33, %v1271_v16  ;;  %v407_v35 = vsel %vm80_vm0, %v1112_v32, %v1275_v18  ;;  %v1118_v16 = vpack.i.bf16 %v371_v39, %v370_v40  ;;  %v53_v39 = vld [vmem:[#allocation5 + $0xb8] sm:$0xff] }
 0x206   :  { %v1029_v36 = vpack.c.bf16 %v407_v35, %v406_v34 }
 0x208   :  { %1030 = vmatprep.subr.bf16.mxu0 %v1029_v36 }
 0x209   :  { %1032 = vmatpush3.bf16.msra.mxu0 %v1029_v36 }
 0x277   :  { %v932_v17 = vpop.f32.mrb[0].mxu1 }
 0x278   :  { %v316_v37 = vpop.f32.mrb[1].mxu1  ;;  %v329_v19 = vsel %vm325_vm2, %v932_v17, -inf }
 0x279   :  { %330 = vmax.xlane.f32.xlu1 %v329_v19  ;;  %v326_v38 = vsel %vm325_vm2, %v316_v37, -inf }
 0x27a   :  { %327 = vmax.xlane.f32.xlu0 %v326_v38  ;;  %v52_v38 = vld [vmem:[#allocation5 + $0x80] sm:$0xff] }
 0x27b   :  { %v1053_v40 = vpack.c.bf16 %v53_v39, %v52_v38  ;;  %v78_v38 = vld [vmem:[#allocation5 + $0x36] ss:$0 sm:$0xff] }
 0x28a   :  { %1119 = vrot.lane.b32.xlu1 %v1118_v16, %s1219_s9  ;;  %v54_v16 = vld [vmem:[#allocation5 + $0x18] sm:$0xff] }
 0x290   :  { %1114 = vrot.lane.b32.xlu0 %v1113_v9, %s1219_s9  ;;  %v74_v9 = vld [vmem:[#allocation5 + $0x32] ss:$0 sm:$0xff] }
 0x306   :  { %v331_v18 = vpop.xlane.xlu1 %330 }
 0x307   :  { %v333_v41 = vsub.f32 %v932_v17, %v331_v18  ;;  %v328_v42 = vpop.xlane.xlu0 %327  ;;  %v55_v18 = vld [vmem:[#allocation5 + $0x50] sm:$0xff] }
 0x308   :  { %v332_v43 = vsub.f32 %v316_v37, %v328_v42  ;;  %v51_v37 = vld [vmem:[#allocation5 + $0x48] sm:$0xff]  ;;  %v1057_v42 = vpack.c.bf16 %v55_v18, %v54_v16  ;;  %v79_v18 = vld [vmem:[#allocation5 + $0x37] ss:$0 sm:$0xff] }
 0x309   :  { %v336_v44 = vmul.f32 1.442695, %v333_v41  ;;  %v56_v41 = vld [vmem:[#allocation5 + $0x88] sm:$0xff] }
 0x30a   :  { %v334_v45 = vmul.f32 1.442695, %v332_v43  ;;  %v1120_v46 = vpop.permute.xlu1 %1119  ;;  %v57_v43 = vld [vmem:[#allocation5 + $0xc0] sm:$0xff]  ;;  %1058 = vmatprep.subr.bf16.mxu1 %v1057_v42 }
 0x30b   :  { %1123 = vpow2.f32 %v336_v44  ;;  %v1122_v47 = vunpack.i.h.bf16 %v1120_v46  ;;  %v1121_v48 = vunpack.i.l.bf16 %v1120_v46  ;;  %v1115_v49 = vpop.permute.xlu0 %1114  ;;  %v1061_v44 = vpack.c.bf16 %v57_v43, %v56_v41  ;;  %v59_v46 = vld [vmem:[#allocation5 + $0x130] sm:$0xff]  ;;  %1060 = vmatpush3.bf16.msra.mxu1 %v1057_v42 }
 0x30c   :  { %1125 = vpow2.f32 %v334_v45  ;;  %v1117_v24 = vunpack.i.h.bf16 %v1115_v49  ;;  %v1116_v50 = vunpack.i.l.bf16 %v1115_v49  ;;  %v58_v45 = vld [vmem:[#allocation5 + $0xf8] sm:$0xff] }
 0x30d   :  { %v410_v52 = vsel %vm80_vm0, %v1121_v48, %v1289_v28  ;;  %v411_v53 = vsel %vm80_vm0, %v1122_v47, %v1287_v27  ;;  %v47_v28 = vld [vmem:[#allocation5 + $0x40] sm:$0xff]  ;;  %v48_v27 = vld [vmem:[#allocation5 + $0x78] sm:$0xff]  ;;  %1062 = vmatprep.subr.bf16.mxu1 %v1061_v44  ;;  %v1065_v47 = vpack.c.bf16 %v59_v46, %v58_v45 }
 0x30e   :  { %v408_v26 = vsel %vm80_vm0, %v1116_v50, %v1281_v21  ;;  %v409_v51 = vsel %vm80_vm0, %v1117_v24, %v1279_v20  ;;  %v1037_v55 = vpack.c.bf16 %v411_v53, %v410_v52  ;;  %v46_v20 = vld [vmem:[#allocation5 + $0x8] sm:$0xff]  ;;  %v1045_v63 = vpack.c.bf16 %v49_v62, %v48_v27  ;;  %v75_v53 = vld [vmem:[#allocation5 + $0x33] ss:$0 sm:$0xff]  ;;  %v73_v27 = vld [vmem:[#allocation5 + $0x31] ss:$0 sm:$0xff] }
 0x30f   :  { %v1033_v54 = vpack.c.bf16 %v409_v51, %v408_v26  ;;  %v1041_v61 = vpack.c.bf16 %v47_v28, %v46_v20  ;;  %1064 = vmatpush3.bf16.msra.mxu1 %v1061_v44  ;;  %v60_v20 = vld [vmem:[#allocation5 + $0x168] sm:$0xff]  ;;  %v61_v28 = vld [vmem:[#allocation5 + $0x1a0] sm:$0xff] }
 0x310   :  { %1066 = vmatprep.subr.bf16.mxu1 %v1065_v47 }
 0x311   :  { %1034 = vmatprep.subr.bf16.mxu0 %v1033_v54 }
 0x312   :  { %1036 = vmatpush3.bf16.msra.mxu0 %v1033_v54 }
 0x313   :  { %1038 = vmatprep.subr.bf16.mxu0 %v1037_v55  ;;  %1068 = vmatpush3.bf16.msra.mxu1 %v1065_v47 }
 0x315   :  { %v1124_v57 = vpop.eup %1123 }
 0x316   :  { %v1126_v59 = vpop.eup %1125  ;;  %1040 = vmatpush3.bf16.msra.mxu0 %v1037_v55  ;;  %v339_v60 = vmul.f32 %v1124_v57, %v71_v58  ;;  %v76_v55 = vld [vmem:[#allocation5 + $0x34] ss:$0 sm:$0xff] }
 0x317   :  { %v338_v21 = vmul.f32 %v1126_v59, %v70_v56  ;;  %1042 = vmatprep.subr.bf16.mxu0 %v1041_v61 }
 0x319   :  { %949 = vmatprep.mubr.msk.f32.mxu0 %vm325_vm2, %v338_v21 }
 0x31a   :  { %950 = vmatmul.mubr.msk.f32.vlgmr.msra.gmra.mrb[2].mxu0 %vm325_vm2, %v339_v60 }
 0x31b   :  { %1044 = vmatpush3.bf16.msra.mxu0 %v1041_v61  ;;  %v1069_v61 = vpack.c.bf16 %v61_v28, %v60_v20 }
 0x31c   :  { %1046 = vmatprep.subr.bf16.mxu0 %v1045_v63 }
 0x31d   :  { %1070 = vmatprep.subr.bf16.mxu1 %v1069_v61 }
 0x31e   :  { %1072 = vmatpush3.bf16.msra.mxu1 %v1069_v61 }
 0x31f   :  { %1048 = vmatpush3.bf16.msra.mxu0 %v1045_v63 }
 0x3ed   :  { %v951_v0 = vpop.f32.mrb[2].mxu0 }
 0x3ee   :  { %497 = vrot.lane.b32.xlu1 %v951_v0, %s1218_s8  ;;  %v484_v1 = vpop.f32.mrb[3].mxu0 }
 0x3ef   :  { %495 = vrot.lane.b32.xlu0 %v484_v1, %s1218_s8 }
 0x460   :  { %v498_v2 = vpop.permute.xlu1 %497 }
 0x461   :  { %1127 = vrcp.f32 %v498_v2  ;;  %v496_v3 = vpop.permute.xlu0 %495 }
 0x462   :  { %1129 = vrcp.f32 %v496_v3 }
 0x46b   :  { %v1128_v4 = vpop.eup %1127 }
 0x46c   :  { %v1130_v6 = vpop.eup %1129  ;;  %v504_v8 = vmul.f32 %v1128_v4, %v951_v0  ;;  %v77_v4 = vld [vmem:[#allocation5 + $0x35] ss:$0 sm:$0xff] }
 0x46d   :  { %v502_v7 = vmul.f32 %v1130_v6, %v484_v1 }
 0x46f   :  { %960 = vmatprep.mubr.msk.f32.mxu0 %vm80_vm0, %v502_v7 }
 0x470   :  { %961 = vmatmul.mubr.msk.f32.vlgmr.msra.gmra.mrb[4].mxu0 %vm80_vm0, %v504_v8 }
 0x543   :  { %v962_v10 = vpop.f32.mrb[4].mxu0 }
 0x544   :  { %v583_v12 = vadd.f32 %v962_v10, %v74_v9  ;;  %v577_v13 = vpop.f32.mrb[5].mxu0 }
 0x545   :  { %v578_v14 = vadd.f32 %v577_v13, %v74_v9 }
 0x546   :  { %v587_v15 = vadd.f32 %v583_v12, %v1267_v11 }
 0x547   :  { %v586_v22 = vadd.f32 %v578_v14, %v1263_v5  ;;  %v50_v5 = vld [vmem:[#allocation5 + $0x10] sm:$0xff] }
 0x548   :  { %v591_v23 = vsel %vm80_vm0, %v587_v15, 0.0  ;;  %v1049_v19 = vpack.c.bf16 %v51_v37, %v50_v5 }
 0x549   :  { %592 = vadd.xlane.f32.xlu1 %v591_v23  ;;  %v588_v25 = vsel %vm80_vm0, %v586_v22, 0.0 }
 0x54a   :  { %589 = vadd.xlane.f32.xlu0 %v588_v25  ;;  %1050 = vmatprep.subr.bf16.mxu0 %v1049_v19 }
 0x54b   :  { %1052 = vmatpush3.bf16.msra.mxu0 %v1049_v19 }
 0x54c   :  { %1054 = vmatprep.subr.bf16.mxu0 %v1053_v40 }
 0x54f   :  { %1056 = vmatpush3.bf16.msra.mxu0 %v1053_v40 }
 0x5d6   :  { %v593_v29 = vpop.xlane.xlu1 %592 }
 0x5d7   :  { %v596_v30 = vmul.f32 0.03125, %v593_v29  ;;  %v590_v31 = vpop.xlane.xlu0 %589 }
 0x5d8   :  { %v595_v32 = vmul.f32 0.03125, %v590_v31 }
 0x5d9   :  { %v598_v33 = vsub.f32 %v587_v15, %v596_v30 }
 0x5da   :  { %v597_v34 = vsub.f32 %v586_v22, %v595_v32 }
 0x5db   :  { %v600_v17 = vmul.f32 %v598_v33, %v598_v33 }
 0x5dc   :  { %v599_v35 = vmul.f32 %v597_v34, %v597_v34 }
 0x5dd   :  { %v604_v11 = vsel %vm80_vm0, %v600_v17, 0.0 }
 0x5de   :  { %v601_v36 = vsel %vm80_vm0, %v599_v35, 0.0 }
 0x5df   :  { %602 = vadd.xlane.f32.xlu0 %v601_v36 }
 0x5e3   :  { %605 = vadd.xlane.f32.xlu0 %v604_v11 }
 0x66c   :  { %v603_v48 = vpop.xlane.xlu0 %602 }
 0x66d   :  { %v607_v49 = vmul.f32 0.03125, %v603_v48 }
 0x66f   :  { %v609_v24 = vadd.f32 1e-05, %v607_v49 }
 0x670   :  { %v606_v50 = vpop.xlane.xlu0 %605 }
 0x671   :  { %1131 = vrsqrt.f32 %v609_v24  ;;  %v608_v26 = vmul.f32 0.03125, %v606_v50 }
 0x673   :  { %v610_v51 = vadd.f32 1e-05, %v608_v26 }
 0x675   :  { %1133 = vrsqrt.f32 %v610_v51 }
 0x67b   :  { %v1132_v52 = vpop.eup %1131 }
 0x67c   :  { %v613_v54 = vmul.f32 %v1132_v52, %v597_v34 }
 0x67e   :  { %v615_v56 = vmul.f32 %v613_v54, %v75_v53 }
 0x67f   :  { %v1134_v57 = vpop.eup %1133 }
 0x680   :  { %v614_v58 = vmul.f32 %v1134_v57, %v598_v33  ;;  %v617_v59 = vadd.f32 %v615_v56, %v76_v55 }
 0x682   :  { %v616_v21 = vmul.f32 %v614_v58, %v75_v53  ;;  %971 = vmatprep.mubr.msk.f32.mxu0 %vm80_vm0, %v617_v59 }
 0x684   :  { %v618_v60 = vadd.f32 %v616_v21, %v76_v55 }
 0x686   :  { %972 = vmatmul.mubr.msk.f32.vlgmr.msra.gmra.mrb[6].mxu0 %vm80_vm0, %v618_v60 }
 0x759   :  { %v973_v62 = vpop.f32.mrb[6].mxu0 }
 0x75a   :  { %v697_v63 = vadd.f32 %v973_v62, %v73_v27  ;;  %v691_v0 = vpop.f32.mrb[7].mxu0 }
 0x75b   :  { %v692_v1 = vadd.f32 %v691_v0, %v73_v27 }
 0x75c   :  { %v701_v3 = vmax.f32 %v697_v63, 0.0 }
 0x75d   :  { %v700_v2 = vmax.f32 %v692_v1, 0.0 }
 0x75f   :  { %990 = vmatprep.mubr.msk.f32.mxu1 %vm325_vm2, %v700_v2 }
 0x760   :  { %991 = vmatmul.mubr.msk.f32.vlgmr.msra.gmra.mrb[2].mxu1 %vm325_vm2, %v701_v3 }
 0x833   :  { %v992_v6 = vpop.f32.mrb[2].mxu1 }
 0x834   :  { %v780_v7 = vadd.f32 %v992_v6, %v77_v4  ;;  %v774_v8 = vpop.f32.mrb[3].mxu1 }
 0x835   :  { %v775_v9 = vadd.f32 %v774_v8, %v77_v4 }
 0x836   :  { %v784_v10 = vadd.f32 %v780_v7, %v618_v60 }
 0x837   :  { %v783_v12 = vadd.f32 %v775_v9, %v617_v59 }
 0x838   :  { %v788_v13 = vsel %vm80_vm0, %v784_v10, 0.0 }
 0x839   :  { %789 = vadd.xlane.f32.xlu0 %v788_v13  ;;  %v785_v14 = vsel %vm80_vm0, %v783_v12, 0.0 }
 0x83a   :  { %786 = vadd.xlane.f32.xlu1 %v785_v14 }
 0x8c6   :  { %v790_v15 = vpop.xlane.xlu0 %789 }
 0x8c7   :  { %v792_v22 = vmul.f32 0.03125, %v790_v15  ;;  %v787_v23 = vpop.xlane.xlu1 %786 }
 0x8c8   :  { %v791_v25 = vmul.f32 0.03125, %v787_v23 }
 0x8c9   :  { %v794_v29 = vsub.f32 %v784_v10, %v792_v22 }
 0x8ca   :  { %v793_v30 = vsub.f32 %v783_v12, %v791_v25 }
 0x8cb   :  { %v796_v31 = vmul.f32 %v794_v29, %v794_v29 }
 0x8cc   :  { %v795_v32 = vmul.f32 %v793_v30, %v793_v30 }
 0x8cd   :  { %v800_v33 = vsel %vm80_vm0, %v796_v31, 0.0 }
 0x8ce   :  { %801 = vadd.xlane.f32.xlu0 %v800_v33  ;;  %v797_v34 = vsel %vm80_vm0, %v795_v32, 0.0 }
 0x8cf   :  { %798 = vadd.xlane.f32.xlu1 %v797_v34 }
 0x95b   :  { %v802_v35 = vpop.xlane.xlu0 %801 }
 0x95c   :  { %v804_v36 = vmul.f32 0.03125, %v802_v35  ;;  %v799_v17 = vpop.xlane.xlu1 %798 }
 0x95d   :  { %v803_v11 = vmul.f32 0.03125, %v799_v17 }
 0x95e   :  { %v806_v5 = vadd.f32 1e-05, %v804_v36 }
 0x95f   :  { %v805_v37 = vadd.f32 1e-05, %v803_v11 }
 0x960   :  { %1135 = vrsqrt.f32 %v806_v5 }
 0x961   :  { %1137 = vrsqrt.f32 %v805_v37 }
 0x96a   :  { %v1136_v19 = vpop.eup %1135 }
 0x96b   :  { %v1138_v39 = vpop.eup %1137  ;;  %v810_v40 = vmul.f32 %v1136_v19, %v794_v29 }
 0x96c   :  { %v809_v16 = vmul.f32 %v1138_v39, %v793_v30 }
 0x96d   :  { %v812_v41 = vmul.f32 %v810_v40, %v78_v38 }
 0x96e   :  { %v811_v42 = vmul.f32 %v809_v16, %v78_v38 }
 0x96f   :  { %v814_v43 = vadd.f32 %v812_v41, %v79_v18 }
 0x970   :  { %v813_v44 = vadd.f32 %v811_v42, %v79_v18 }
 0x971   :  { %816 = vst.msk [vmem:[#allocation7 + $0x8] sm:$0xff] %vm80_vm0, %v814_v43 }
 0x972   :  { %815 = vst.msk [vmem:[#allocation7] sm:$0xff] %vm80_vm0, %v813_v44 }
 0x973   :  { %1194 = shalt.err (!%p1191_p6)
}
 0x974   :  { %s1195_s15 = scalar_lea.hbm %s1414_s2, 256 }
 0x975   :  { %p1196_p7 = scmp.ne.s32.totalorder %s1414_s2, %s1195_s15  ;;  %p1199_p8 = scmp.lt.u32.totalorder %s1195_s15, %s1414_s2 }
 0x977   :  { %p1201_p9 = pnand %p1199_p8, %p1196_p7 }
 0x979   :  { %1204 = shalt.err (!%p1201_p9)
}
 0x97a   :  { %828 = dma.vmem_to_hbm [thread:$0]  %s823_s11, 256, %s1414_s2, [#allocation4], %s1212_s19, %s1212_s19, %s1213_s20  }
 0x97b   :  { %1209 = dma.done.wait [#allocation4], 256  }
 0x97c   :  { %1210 = vsyncadd [#allocation4], 4294967040 }
 0x97d   :  { %832 = vsyncpa [#allocation3], 1 }
 0x97e   :  { %833 = vsyncpa [#allocation6], 1 }
 0x97f   :  { %834 = vsyncpa [#allocation4], 1 }

</bundles_post_ra>
